<compile_context>
chip_gen: v7x
topology: tpu7x:2x2x1
jax: 0.10.0
libtpu: 0.0.40
codegen_flags: <defaults>
</compile_context>

<pallas_src>
import functools

import jax
import jax.numpy as jnp
from jax.experimental import pallas as pl
from jax.experimental.pallas import tpu as pltpu

BN_EPS = 1e-5
LANES = 128
DEFAULT_TILE_M = 8192          # fallback streaming tile (rows); multiple of 8


def _round_up(a, b):
    return (a + b - 1) // b * b


def _pick_vmem_limit():
    """Per-generation VMEM limit: ~60% of physical, clamped to [32, 100] MiB."""
    try:
        cap = int(pltpu.get_tpu_info().vmem_capacity_bytes)
    except Exception:
        cap = 64 * 1024 * 1024
    return int(min(100 * 1024 * 1024, max(32 * 1024 * 1024, 0.6 * cap)))


# ---------------------------------------------------------------------------
# Fused fast path: whole cross section in one VMEM block, one grid step.
# ---------------------------------------------------------------------------
def _fused_kernel(x_ref, wt_ref, gamma_ref, beta_ref, o_ref, *, f_out, m_rows):
    # Linear (no bias); lane-dense (M, F_out_pad) result via padded W.
    y = jnp.dot(x_ref[...], wt_ref[...], preferred_element_type=jnp.float32)
    inv_m = jnp.float32(1.0 / m_rows)
    mean = jnp.sum(y, axis=0, keepdims=True) * inv_m
    yc = y - mean                                    # centered -> stable var
    var = jnp.sum(yc * yc, axis=0, keepdims=True) * inv_m
    scale = jax.lax.rsqrt(var + jnp.float32(BN_EPS)) * gamma_ref[...]
    out = yc * scale + beta_ref[...]
    # Narrow (masked) store of the unpadded F_out columns; padded lanes never
    # reach HBM.
    o_ref[...] = out[:, :f_out].astype(o_ref.dtype)


# ---------------------------------------------------------------------------
# Fallback pass 1: streaming batch statistics -> folded BN affine.
# ---------------------------------------------------------------------------
def _bn_stats_kernel(x_ref, wt_ref, gamma_ref, beta_ref,
                     scale_ref, shift_ref, sum_acc, sq_acc,
                     *, m_rows, tile_m, ragged):
    i = pl.program_id(0)
    last = pl.num_programs(0) - 1

    @pl.when(i == 0)
    def _init():
        sum_acc[...] = jnp.zeros_like(sum_acc)
        sq_acc[...] = jnp.zeros_like(sq_acc)

    y = jnp.dot(x_ref[...], wt_ref[...], preferred_element_type=jnp.float32)

    if ragged:
        # Only the last tile has rows past the true batch size; gate the
        # iota/compare/select there instead of paying it every tile.
        @pl.when(i < last)
        def _full_tile():
            sum_acc[...] += jnp.sum(y, axis=0, keepdims=True)
            sq_acc[...] += jnp.sum(y * y, axis=0, keepdims=True)

        @pl.when(i == last)
        def _ragged_tile():
            row = (jax.lax.broadcasted_iota(jnp.int32, (y.shape[0], 1), 0)
                   + i * tile_m)
            ym = jnp.where(row < m_rows, y, 0.0)
            sum_acc[...] += jnp.sum(ym, axis=0, keepdims=True)
            sq_acc[...] += jnp.sum(ym * ym, axis=0, keepdims=True)
    else:
        sum_acc[...] += jnp.sum(y, axis=0, keepdims=True)
        sq_acc[...] += jnp.sum(y * y, axis=0, keepdims=True)

    @pl.when(i == last)
    def _finalize():
        inv_m = jnp.float32(1.0 / m_rows)
        mean = sum_acc[...] * inv_m
        # Biased batch variance (BatchNorm1d training-mode normalization).
        # NOTE: E[y^2] - mean^2 can cancel for very large M / large |mean|;
        # the clamp keeps it non-negative.  The fused path uses the centered
        # formula and is preferred whenever it fits VMEM.
        var = jnp.maximum(sq_acc[...] * inv_m - mean * mean, 0.0)
        scale = jax.lax.rsqrt(var + jnp.float32(BN_EPS)) * gamma_ref[...]
        scale_ref[...] = scale
        shift_ref[...] = beta_ref[...] - mean * scale


# ---------------------------------------------------------------------------
# Fallback pass 2: apply normalization (parallel over M-tiles).
# ---------------------------------------------------------------------------
def _bn_apply_kernel(x_ref, wt_ref, scale_ref, shift_ref, o_ref, *, f_out):
    y = jnp.dot(x_ref[...], wt_ref[...], preferred_element_type=jnp.float32)
    out = y * scale_ref[...] + shift_ref[...]
    # Ragged last tile: garbage rows of the padded input block produce garbage
    # output rows, but rows are independent and Pallas only writes back the
    # valid region of the output block, so this is safe.
    o_ref[...] = out[:, :f_out].astype(o_ref.dtype)


# ---------------------------------------------------------------------------
# Wrapper.
# ---------------------------------------------------------------------------
def orthogonal_weak_factors_icirmax(x, weight, gamma, beta, *,
                                    tile_m=DEFAULT_TILE_M,
                                    max_single_block_rows=None):
    """Forward of orthogonalWeakFactors_ICIRmax.

    x:      (M, F_in)     cross-sectional factor matrix.
    weight: (F_out, F_in) torch nn.Linear weight (bias=False).
    gamma, beta: (F_out,) BatchNorm1d affine parameters.
    Returns (M, F_out) == BatchNorm1d(training)(Linear(x)).
    """
    m, f_in = x.shape
    f_out = weight.shape[0]
    f_out_pad = _round_up(f_out, LANES)

    vmem_limit = _pick_vmem_limit()

    # Fold the weight transpose and 128-lane padding into one tiny host op
    # (reused by every kernel).  Zero padded columns give var = 0 ->
    # rsqrt(eps) finite; padded lanes never reach HBM.
    w_pad = jnp.zeros((f_in, f_out_pad), x.dtype).at[:, :f_out].set(
        jnp.asarray(weight, x.dtype).T)
    gamma_pad = jnp.zeros((1, f_out_pad), jnp.float32).at[0, :f_out].set(
        gamma.astype(jnp.float32))
    beta_pad = jnp.zeros((1, f_out_pad), jnp.float32).at[0, :f_out].set(
        beta.astype(jnp.float32))

    # Rough per-row VMEM footprint of a resident block: double-buffered x tile
    # + double-buffered lane-padded output block + ~2 f32 lane-padded y temps.
    x_bytes = jnp.dtype(x.dtype).itemsize
    per_row = 2 * f_in * x_bytes + 4 * LANES * 4
    if max_single_block_rows is None:
        max_single_block_rows = (
            max(0, (vmem_limit - (4 << 20)) // per_row)) // 8 * 8

    def _cparams(sem):
        return pltpu.CompilerParams(dimension_semantics=sem,
                                    vmem_limit_bytes=vmem_limit)

    w_spec = pl.BlockSpec((f_in, f_out_pad), lambda i: (0, 0))
    vec_spec = pl.BlockSpec((1, f_out_pad), lambda i: (0, 0))

    # ---- fused single-block fast path (the common case) --------------------
    if m <= max_single_block_rows:
        return pl.pallas_call(
            functools.partial(_fused_kernel, f_out=f_out, m_rows=m),
            grid=(1,),
            in_specs=[pl.BlockSpec((m, f_in), lambda i: (0, 0)),
                      w_spec, vec_spec, vec_spec],
            out_specs=pl.BlockSpec((m, f_out), lambda i: (0, 0)),
            out_shape=jax.ShapeDtypeStruct((m, f_out), x.dtype),
            compiler_params=_cparams(("arbitrary",)),
        )(x, w_pad, gamma_pad, beta_pad)

    # ---- streaming two-pass fallback (very large cross sections) -----------
    # tile_m must be a multiple of 8 (sublane rule); cap by VMEM-derived bound.
    tm = min(_round_up(max(tile_m, 8), 8),
             _round_up(m, 8),
             max(max_single_block_rows, 512))
    n_tiles = pl.cdiv(m, tm)
    ragged = (m % tm) != 0

    x_spec = pl.BlockSpec((tm, f_in), lambda i: (i, 0))

    # pass 1: batch statistics -> folded (scale, shift)
    scale, shift = pl.pallas_call(
        functools.partial(_bn_stats_kernel, m_rows=m, tile_m=tm, ragged=ragged),
        grid=(n_tiles,),
        in_specs=[x_spec, w_spec, vec_spec, vec_spec],
        out_specs=(vec_spec, vec_spec),
        out_shape=(jax.ShapeDtypeStruct((1, f_out_pad), jnp.float32),
                   jax.ShapeDtypeStruct((1, f_out_pad), jnp.float32)),
        scratch_shapes=[pltpu.VMEM((1, f_out_pad), jnp.float32),
                        pltpu.VMEM((1, f_out_pad), jnp.float32)],
        compiler_params=_cparams(("arbitrary",)),   # sequential accumulation
    )(x, w_pad, gamma_pad, beta_pad)

    # pass 2: recompute y per tile and normalize (parallel across tiles/TCs)
    out = pl.pallas_call(
        functools.partial(_bn_apply_kernel, f_out=f_out),
        grid=(n_tiles,),
        in_specs=[x_spec, w_spec, vec_spec, vec_spec],
        out_specs=pl.BlockSpec((tm, f_out), lambda i: (i, 0)),
        out_shape=jax.ShapeDtypeStruct((m, f_out), x.dtype),
        compiler_params=_cparams(("parallel",)),
    )(x, w_pad, scale, shift)
    return out


# ---------------------------------------------------------------------------
# Pure-JAX reference (mirrors torch: Linear -> BatchNorm1d training mode).
# ---------------------------------------------------------------------------
def _reference(x, weight, gamma, beta):
    y = x.astype(jnp.float32) @ weight.astype(jnp.float32).T
    mean = jnp.mean(y, axis=0, keepdims=True)
    var = jnp.mean((y - mean) ** 2, axis=0, keepdims=True)
    return (y - mean) / jnp.sqrt(var + BN_EPS) * gamma[None, :] + beta[None, :]


if __name__ == "__main__":
    key = jax.random.PRNGKey(0)
    k_x, k_w, k_g, k_b = jax.random.split(key, 4)

    M = 64                       # rows in the cross-sectional batch
    input_factor_number = 16
    output_factor_number = 8

    x = jax.random.normal(k_x, (M, input_factor_number), dtype=jnp.float32)

    bound = 1.0 / (input_factor_number ** 0.5)
    weight = jax.random.uniform(
        k_w, (output_factor_number, input_factor_number),
        minval=-bound, maxval=bound, dtype=jnp.float32)
    gamma = jax.random.uniform(k_g, (output_factor_number,),
                               minval=0.5, maxval=1.5, dtype=jnp.float32)
    beta = 0.1 * jax.random.normal(k_b, (output_factor_number,),
                                   dtype=jnp.float32)

    ref = _reference(x, weight, gamma, beta)

    # Path 1: fused single-block kernel (default / common path).
    out = jax.block_until_ready(
        orthogonal_weak_factors_icirmax(x, weight, gamma, beta))
    assert out.shape == (M, output_factor_number)
    assert jnp.allclose(out, ref, atol=1e-4, rtol=1e-4), \
        float(jnp.max(jnp.abs(out - ref)))

    # Path 2: forced streaming two-pass fallback, exact multiple of tile_m.
    out2 = jax.block_until_ready(orthogonal_weak_factors_icirmax(
        x, weight, gamma, beta, tile_m=32, max_single_block_rows=0))
    assert jnp.allclose(out2, ref, atol=1e-4, rtol=1e-4), \
        float(jnp.max(jnp.abs(out2 - ref)))

    # Path 3: forced fallback with a ragged last tile (masked stats path).
    M3 = 60
    x3 = x[:M3]
    ref3 = _reference(x3, weight, gamma, beta)
    out3 = jax.block_until_ready(orthogonal_weak_factors_icirmax(
        x3, weight, gamma, beta, tile_m=32, max_single_block_rows=0))
    assert out3.shape == (M3, output_factor_number)
    assert jnp.allclose(out3, ref3, atol=1e-4, rtol=1e-4), \
        float(jnp.max(jnp.abs(out3 - ref3)))

    print("KERNEL_OK")
</pallas_src>

<mosaic_0001>
module attributes {stable_mosaic.version = 11 : i64} {
  func.func @_fused_kernel(%arg0: i32, %arg1: memref<64x16xf32, #tpu.memory_space<vmem>>, %arg2: memref<16x128xf32, #tpu.memory_space<vmem>>, %arg3: memref<1x128xf32, #tpu.memory_space<vmem>>, %arg4: memref<1x128xf32, #tpu.memory_space<vmem>>, %arg5: memref<64x8xf32, #tpu.memory_space<vmem>>) attributes {dimension_semantics = [#tpu.dimension_semantics<arbitrary>], iteration_bounds = array<i64: 1>, scalar_prefetch = 0 : i64, scratch_operands = 0 : i64, tpu.core_type = #tpu.core_type<tc>, window_params = [{pipeline_mode = #tpu.pipeline_mode<synchronous>, transform_indices = @transform_0, window_bounds = array<i64: 64, 16>}, {pipeline_mode = #tpu.pipeline_mode<synchronous>, transform_indices = @transform_1, window_bounds = array<i64: 16, 128>}, {pipeline_mode = #tpu.pipeline_mode<synchronous>, transform_indices = @transform_2, window_bounds = array<i64: 1, 128>}, {pipeline_mode = #tpu.pipeline_mode<synchronous>, transform_indices = @transform_3, window_bounds = array<i64: 1, 128>}, {pipeline_mode = #tpu.pipeline_mode<synchronous>, transform_indices = @transform_4, window_bounds = array<i64: 64, 8>}]} {
    %c0 = arith.constant 0 : index
    %c0_0 = arith.constant 0 : index
    %0 = vector.load %arg1[%c0, %c0_0] : memref<64x16xf32, #tpu.memory_space<vmem>>, vector<64x16xf32>
    %c0_1 = arith.constant 0 : index
    %c0_2 = arith.constant 0 : index
    %1 = vector.load %arg2[%c0_1, %c0_2] : memref<16x128xf32, #tpu.memory_space<vmem>>, vector<16x128xf32>
    %cst = arith.constant dense<0.000000e+00> : vector<64x128xf32>
    %2 = tpu.matmul %0, %1, %cst {dimension_numbers = #tpu.dot_dimension_numbers<[1], [0], [0], [1], [0, 0, 1, 1], [], []>} : vector<64x16xf32>, vector<16x128xf32>, vector<64x128xf32> -> vector<64x128xf32>
    %cst_3 = arith.constant dense<0.000000e+00> : vector<128xf32>
    %3 = vector.multi_reduction <add>, %2, %cst_3 [0] : vector<64x128xf32> to vector<128xf32>
    %4 = vector.shape_cast %3 : vector<128xf32> to vector<1x128xf32>
    %cst_4 = arith.constant 1.562500e-02 : f32
    %5 = vector.broadcast %cst_4 : f32 to vector<1x128xf32>
    %6 = arith.mulf %4, %5 : vector<1x128xf32>
    %7 = vector.broadcast %6 : vector<1x128xf32> to vector<64x128xf32>
    %8 = arith.subf %2, %7 : vector<64x128xf32>
    %9 = arith.mulf %8, %8 : vector<64x128xf32>
    %cst_5 = arith.constant dense<0.000000e+00> : vector<128xf32>
    %10 = vector.multi_reduction <add>, %9, %cst_5 [0] : vector<64x128xf32> to vector<128xf32>
    %11 = vector.shape_cast %10 : vector<128xf32> to vector<1x128xf32>
    %cst_6 = arith.constant 1.562500e-02 : f32
    %12 = vector.broadcast %cst_6 : f32 to vector<1x128xf32>
    %13 = arith.mulf %11, %12 : vector<1x128xf32>
    %cst_7 = arith.constant 9.99999974E-6 : f32
    %14 = vector.broadcast %cst_7 : f32 to vector<1x128xf32>
    %15 = arith.addf %13, %14 : vector<1x128xf32>
    %16 = math.rsqrt %15 : vector<1x128xf32>
    %c0_8 = arith.constant 0 : index
    %c0_9 = arith.constant 0 : index
    %17 = vector.load %arg3[%c0_8, %c0_9] : memref<1x128xf32, #tpu.memory_space<vmem>>, vector<1x128xf32>
    %18 = arith.mulf %16, %17 : vector<1x128xf32>
    %19 = vector.broadcast %18 : vector<1x128xf32> to vector<64x128xf32>
    %20 = arith.mulf %8, %19 : vector<64x128xf32>
    %c0_10 = arith.constant 0 : index
    %c0_11 = arith.constant 0 : index
    %21 = vector.load %arg4[%c0_10, %c0_11] : memref<1x128xf32, #tpu.memory_space<vmem>>, vector<1x128xf32>
    %22 = vector.broadcast %21 : vector<1x128xf32> to vector<64x128xf32>
    %23 = arith.addf %20, %22 : vector<64x128xf32>
    %24 = vector.extract_strided_slice %23 {offsets = [0, 0], sizes = [64, 8], strides = [1, 1]} : vector<64x128xf32> to vector<64x8xf32>
    %c0_12 = arith.constant 0 : index
    %c0_13 = arith.constant 0 : index
    %25 = vector.load %arg5[%c0_12, %c0_13] : memref<64x8xf32, #tpu.memory_space<vmem>>, vector<64x8xf32>
    tpu.vector_store %arg5[%c0_12, %c0_13], %24 {strides = array<i32>} : memref<64x8xf32, #tpu.memory_space<vmem>>, vector<64x8xf32>,
    return
  }
  func.func @transform_0(%arg0: i32) -> (i32, i32) {
    %c0_i32 = arith.constant 0 : i32
    %c0_i32_0 = arith.constant 0 : i32
    %c0_i32_1 = arith.constant 0 : i32
    return %c0_i32, %c0_i32_0 : i32, i32
  }
  func.func @transform_1(%arg0: i32) -> (i32, i32) {
    %c0_i32 = arith.constant 0 : i32
    %c0_i32_0 = arith.constant 0 : i32
    %c0_i32_1 = arith.constant 0 : i32
    return %c0_i32, %c0_i32_0 : i32, i32
  }
  func.func @transform_2(%arg0: i32) -> (i32, i32) {
    %c0_i32 = arith.constant 0 : i32
    %c0_i32_0 = arith.constant 0 : i32
    %c0_i32_1 = arith.constant 0 : i32
    return %c0_i32, %c0_i32_0 : i32, i32
  }
  func.func @transform_3(%arg0: i32) -> (i32, i32) {
    %c0_i32 = arith.constant 0 : i32
    %c0_i32_0 = arith.constant 0 : i32
    %c0_i32_1 = arith.constant 0 : i32
    return %c0_i32, %c0_i32_0 : i32, i32
  }
  func.func @transform_4(%arg0: i32) -> (i32, i32) {
    %c0_i32 = arith.constant 0 : i32
    %c0_i32_0 = arith.constant 0 : i32
    %c0_i32_1 = arith.constant 0 : i32
    return %c0_i32, %c0_i32_0 : i32, i32
  }
}

</mosaic_0001>

<bundles_post_ra>
// kernel: tpu_custom_call.1
= control target key start
LH: loop header
LB: loop body
LE: loop exit
PB: predicated region body
PF: predicated region fallthrough
CT: control target
= control target key end

     0   :  { %vm27_vm0 = vcmask 130048   ;;  %vm232_vm1 = vcmask 64512   ;;  %s389_s1 = inlined_call_operand.vmem [shape: f32[16,128], index: 1, kind: input, shape index: {}]   ;;  %s390_s0 = inlined_call_operand.vmem [shape: f32[64,16], index: 0, kind: input, shape index: {}]   ;;  %s391_s2 = inlined_call_operand.vmem [shape: f32[1,128], index: 2, kind: input, shape index: {}]   ;;  %s392_s3 = inlined_call_operand.vmem [shape: f32[1,128], index: 3, kind: input, shape index: {}]   ;;  %s393_s4 = inlined_call_operand.vmem [shape: f32[64,8], index: 4, kind: output, shape index: {}]  }
   0x1   :  { %v25_v0 = vld [vmem:[%s389_s1] sm:$0xff]  ;;  %v26_v1 = vld [vmem:[%s389_s1 + $0x8] sm:$0xff]  ;;  %v19_v7 = vld [vmem:[%s390_s0 + $0x10] sm:$0xff] }
   0x2   :  { %v17_v2 = vld [vmem:[%s390_s0] sm:$0xff]  ;;  %v280_v3 = vpack.c.bf16 %v26_v1, %v25_v0  ;;  %v18_v5 = vld [vmem:[%s390_s0 + $0x8] sm:$0xff]  ;;  %v23_v8 = vld [vmem:[%s390_s0 + $0x30] sm:$0xff]  ;;  %v205_v0 = vlaneseq }
   0x3   :  { %268 = vmatprep.mubr.msk.f32.mxu0 %vm27_vm0, %v17_v2  ;;  %v21_v4 = vld [vmem:[%s390_s0 + $0x20] sm:$0xff]  ;;  %v22_v6 = vld [vmem:[%s390_s0 + $0x28] sm:$0xff]  ;;  %v20_v9 = vld [vmem:[%s390_s0 + $0x18] sm:$0xff] }
   0x4   :  { %281 = vmatprep.subr.bf16.mxu0 %v280_v3  ;;  %284 = vmatprep.subr.bf16.mxu1 %v280_v3  ;;  %v24_v10 = vld [vmem:[%s390_s0 + $0x38] sm:$0xff]  ;;  %v206_v1 = vshrl.u32 %v205_v0, 7  ;;  %v203_v2 = vld [vmem:[%s391_s2] sm:$0x1] }
   0x5   :  { %283 = vmatpush3.bf16.msra.mxu0 %v280_v3  ;;  %285 = vmatpush3.bf16.msra.mxu1 %v280_v3 }
   0x6   :  { %274 = vmatprep.mubr.msk.f32.mxu1 %vm27_vm0, %v21_v4  ;;  %v207_v3 = vsub.s32 0, %v206_v1 }
   0x8   :  { %269 = vmatmul.mubr.msk.f32.vlgmr.msra.gmra.mrb[0].mxu0 %vm27_vm0, %v18_v5  ;;  %275 = vmatmul.mubr.msk.f32.vlgmr.msra.gmra.mrb[0].mxu1 %vm27_vm0, %v22_v6 }
   0x9   :  { %271 = vmatprep.mubr.msk.f32.mxu0 %vm27_vm0, %v19_v7  ;;  %277 = vmatprep.mubr.msk.f32.mxu1 %vm27_vm0, %v23_v8  ;;  %v253_v7 = vld [vmem:[%s392_s3] ss:$0 sm:$0xff] }
   0xc   :  { %272 = vmatmul.mubr.msk.f32.gmra.mrb[2].mxu0 %vm27_vm0, %v20_v9  ;;  %278 = vmatmul.mubr.msk.f32.gmra.mrb[2].mxu1 %vm27_vm0, %v24_v10 }
  0xdb   :  { %v270_v11 = vpop.f32.mrb[0].mxu0  ;;  %v276_v12 = vpop.f32.mrb[0].mxu1 }
  0xdc   :  { %v118_v13 = vpop.f32.mrb[1].mxu0  ;;  %v138_v14 = vpop.f32.mrb[1].mxu1 }
  0xdd   :  { %v157_v15 = vadd.f32 %v270_v11, %v118_v13 }
  0xdf   :  { %v273_v16 = vpop.f32.mrb[2].mxu0  ;;  %v279_v17 = vpop.f32.mrb[2].mxu1 }
  0xe0   :  { %v128_v18 = vpop.f32.mrb[3].mxu0  ;;  %v148_v19 = vpop.f32.mrb[3].mxu1 }
  0xe1   :  { %v158_v20 = vadd.f32 %v157_v15, %v128_v18 }
  0xe3   :  { %v159_v21 = vadd.f32 %v273_v16, %v158_v20 }
  0xe5   :  { %v160_v22 = vadd.f32 %v159_v21, %v138_v14 }
  0xe7   :  { %v161_v23 = vadd.f32 %v276_v12, %v160_v22 }
  0xe9   :  { %v162_v24 = vadd.f32 %v161_v23, %v148_v19 }
  0xeb   :  { %v163_v25 = vadd.f32 %v279_v17, %v162_v24 }
  0xed   :  { %v164_v26 = vrot.slane %v163_v25, 4 }
  0xef   :  { %v165_v27 = vadd.f32 %v164_v26, %v163_v25 }
  0xf1   :  { %v166_v28 = vrot.slane %v165_v27, 2 }
  0xf3   :  { %v167_v29 = vadd.f32 %v166_v28, %v165_v27 }
  0xf5   :  { %v168_v30 = vrot.slane %v167_v29, 1 }
  0xf7   :  { %v169_v31 = vadd.f32 %v168_v30, %v167_v29 }
  0xf9   :  { %v170_v32 = vmul.f32 0.015625, %v169_v31 }
  0xfb   :  { %v171_v33 = vsub.f32 %v118_v13, %v170_v32  ;;  %v172_v34 = vsub.f32 %v270_v11, %v170_v32  ;;  %v173_v35 = vsub.f32 %v128_v18, %v170_v32  ;;  %v174_v36 = vsub.f32 %v273_v16, %v170_v32 }
  0xfc   :  { %v175_v37 = vsub.f32 %v138_v14, %v170_v32  ;;  %v176_v38 = vsub.f32 %v276_v12, %v170_v32  ;;  %v177_v39 = vsub.f32 %v148_v19, %v170_v32  ;;  %v178_v40 = vsub.f32 %v279_v17, %v170_v32 }
  0xfd   :  { %v179_v41 = vmul.f32 %v171_v33, %v171_v33  ;;  %v180_v42 = vmul.f32 %v172_v34, %v172_v34  ;;  %v181_v43 = vmul.f32 %v173_v35, %v173_v35  ;;  %v182_v45 = vmul.f32 %v174_v36, %v174_v36 }
  0xfe   :  { %v183_v47 = vmul.f32 %v175_v37, %v175_v37  ;;  %v184_v49 = vmul.f32 %v176_v38, %v176_v38  ;;  %v185_v51 = vmul.f32 %v177_v39, %v177_v39  ;;  %v186_v53 = vmul.f32 %v178_v40, %v178_v40 }
  0xff   :  { %v187_v44 = vadd.f32 %v180_v42, %v179_v41 }
 0x101   :  { %v188_v46 = vadd.f32 %v187_v44, %v181_v43 }
 0x103   :  { %v189_v48 = vadd.f32 %v188_v46, %v182_v45 }
 0x105   :  { %v190_v50 = vadd.f32 %v189_v48, %v183_v47 }
 0x107   :  { %v191_v52 = vadd.f32 %v190_v50, %v184_v49 }
 0x109   :  { %v192_v54 = vadd.f32 %v191_v52, %v185_v51 }
 0x10b   :  { %v193_v55 = vadd.f32 %v192_v54, %v186_v53 }
 0x10d   :  { %v194_v56 = vrot.slane %v193_v55, 4 }
 0x10f   :  { %v195_v57 = vadd.f32 %v194_v56, %v193_v55 }
 0x111   :  { %v196_v58 = vrot.slane %v195_v57, 2 }
 0x113   :  { %v197_v59 = vadd.f32 %v196_v58, %v195_v57 }
 0x115   :  { %v198_v60 = vrot.slane %v197_v59, 1 }
 0x117   :  { %v199_v61 = vadd.f32 %v198_v60, %v197_v59 }
 0x119   :  { %v200_v62 = vmul.f32 0.015625, %v199_v61 }
 0x11b   :  { %v201_v63 = vadd.f32 1e-05, %v200_v62 }
 0x11d   :  { %286 = vrsqrt.f32 %v201_v63 }
 0x127   :  { %v287_v4 = vpop.eup %286 }
 0x128   :  { %v204_v5 = vmul.f32 %v287_v4, %v203_v2 }
 0x12a   :  { %v208_v6 = vrot.slane %v204_v5, %v207_v3 }
 0x12c   :  { %v209_v8 = vmul.f32 %v208_v6, %v171_v33  ;;  %v210_v9 = vmul.f32 %v208_v6, %v172_v34  ;;  %v211_v10 = vmul.f32 %v208_v6, %v173_v35  ;;  %v212_v11 = vmul.f32 %v208_v6, %v174_v36 }
 0x12d   :  { %v213_v12 = vmul.f32 %v208_v6, %v175_v37  ;;  %v214_v13 = vmul.f32 %v208_v6, %v176_v38  ;;  %v215_v14 = vmul.f32 %v208_v6, %v177_v39  ;;  %v216_v15 = vmul.f32 %v208_v6, %v178_v40 }
 0x12e   :  { %v224_v16 = vadd.f32 %v253_v7, %v209_v8  ;;  %v225_v17 = vadd.f32 %v253_v7, %v210_v9  ;;  %v226_v18 = vadd.f32 %v253_v7, %v211_v10  ;;  %v227_v19 = vadd.f32 %v253_v7, %v212_v11 }
 0x12f   :  { %v228_v20 = vadd.f32 %v253_v7, %v213_v12  ;;  %v229_v21 = vadd.f32 %v253_v7, %v214_v13  ;;  %v230_v22 = vadd.f32 %v253_v7, %v215_v14  ;;  %v231_v23 = vadd.f32 %v253_v7, %v216_v15 }
 0x130   :  { %233 = vst.msk [vmem:[%s393_s4] sm:$0xff] %vm232_vm1, %v224_v16  ;;  %234 = vst.msk [vmem:[%s393_s4 + $0x8] sm:$0xff] %vm232_vm1, %v225_v17 }
 0x131   :  { %235 = vst.msk [vmem:[%s393_s4 + $0x10] sm:$0xff] %vm232_vm1, %v226_v18  ;;  %236 = vst.msk [vmem:[%s393_s4 + $0x18] sm:$0xff] %vm232_vm1, %v227_v19 }
 0x132   :  { %237 = vst.msk [vmem:[%s393_s4 + $0x20] sm:$0xff] %vm232_vm1, %v228_v20  ;;  %238 = vst.msk [vmem:[%s393_s4 + $0x28] sm:$0xff] %vm232_vm1, %v229_v21 }
 0x133   :  { %239 = vst.msk [vmem:[%s393_s4 + $0x30] sm:$0xff] %vm232_vm1, %v230_v22  ;;  %240 = vst.msk [vmem:[%s393_s4 + $0x38] sm:$0xff] %vm232_vm1, %v231_v23 }

</bundles_post_ra>
